<compile_context>
chip_gen: v6e
topology: v6e:2x2x1
jax: 0.10.0
libtpu: 0.0.40
codegen_flags: <defaults>
</compile_context>

<pallas_src>
import jax
import jax.numpy as jnp
from jax.experimental import pallas as pl
from jax.experimental.pallas import tpu as pltpu


def _conv_max_relu_kernel(gidx_ref, emb_ref, w_ref, b_ref, o_ref):
    # gidx_ref: (M, K) int32   im2col indices, gidx[b*L_out + t, k] = ids[b, t+k]
    # emb_ref : (V, E) f32     full embedding table (resident in VMEM)
    # w_ref   : (K, E, C) f32  conv taps (torch weight transposed)
    # b_ref   : (1, C) f32     conv bias
    # o_ref   : (B, C) f32     pooled + relu'd output
    M, K = gidx_ref.shape
    V, E = emb_ref.shape
    C = w_ref.shape[2]
    B = o_ref.shape[0]
    L_out = M // B

    emb = emb_ref[...]                                   # (V, E)
    gidx = gidx_ref[...]                                 # (M, K) int32

    # Fused embedding gather + valid Conv1d, all on the MXU:
    #   acc[m, c] = sum_k sum_e emb[gidx[m, k], e] * w[k, e, c]
    # The per-tap gather is expressed as onehot(ids_k) @ emb (exact: one-hot
    # picks a single table row), so there is no data-dependent addressing and
    # every matmul operand is a full, aligned tile.
    iota_v = jax.lax.broadcasted_iota(jnp.int32, (M, V), 1)
    acc = jnp.zeros((M, C), jnp.float32)
    for k in range(K):                                   # K tiny & static -> unrolled
        ids_k = gidx[:, k:k + 1]                         # (M, 1)
        oh_k = (iota_v == ids_k).astype(jnp.float32)     # (M, V) one-hot rows
        x_k = jnp.dot(oh_k, emb, preferred_element_type=jnp.float32)        # (M, E)
        acc = acc + jnp.dot(x_k, w_ref[k], preferred_element_type=jnp.float32)  # (M, C)

    # TODO(synk): dropout is inference-mode identity here (only active in training).

    # Max-over-time per batch element; bias is constant over time so it is
    # added after the pool (saves L_out x C adds), then ReLU.
    rows = []
    for bi in range(B):                                  # B tiny & static -> unrolled
        seg = acc[bi * L_out:(bi + 1) * L_out, :]        # (L_out, C)
        rows.append(jnp.max(seg, axis=0, keepdims=True)) # (1, C)
    pooled = jnp.concatenate(rows, axis=0)               # (B, C)
    o_ref[...] = jnp.maximum(pooled + b_ref[...], 0.0).astype(o_ref.dtype)


def convolution_forward(ids, emb_table, conv_w, conv_b):
    """ids: (B, L) int32; emb_table: (V, E); conv_w: (C, E, K) torch layout; conv_b: (C,)."""
    B, L = ids.shape
    C, E, K = conv_w.shape
    V = emb_table.shape[0]
    L_out = L - K + 1
    M = B * L_out

    # Glue: pure int32 index plumbing + weight re-layout (no float activation
    # round-trips through HBM).
    t_idx = jnp.arange(L_out)[:, None] + jnp.arange(K)[None, :]   # (L_out, K)
    gidx = ids[:, t_idx].reshape(M, K).astype(jnp.int32)          # (M, K)
    w = jnp.transpose(conv_w, (2, 1, 0)).astype(jnp.float32)      # (K, E, C)
    b2 = conv_b.reshape(1, C).astype(jnp.float32)
    emb = emb_table.astype(jnp.float32)

    flops = 2 * M * K * V * E + 2 * M * K * E * C
    bytes_accessed = 4 * (gidx.size + emb.size + w.size + b2.size + B * C)

    out = pl.pallas_call(
        _conv_max_relu_kernel,
        out_shape=jax.ShapeDtypeStruct((B, C), jnp.float32),
        # Single invocation (no grid): the whole working set (<100 KB) lives in
        # VMEM; everything is full-array blocks.
        in_specs=[
            pl.BlockSpec(memory_space=pltpu.MemorySpace.VMEM),   # gidx
            pl.BlockSpec(memory_space=pltpu.MemorySpace.VMEM),   # emb table
            pl.BlockSpec(memory_space=pltpu.MemorySpace.VMEM),   # conv taps
            pl.BlockSpec(memory_space=pltpu.MemorySpace.VMEM),   # bias
        ],
        out_specs=pl.BlockSpec(memory_space=pltpu.MemorySpace.VMEM),
        cost_estimate=pl.CostEstimate(
            flops=flops, transcendentals=0, bytes_accessed=bytes_accessed),
    )(gidx, emb, w, b2)
    return out                                                    # (B, C)


if __name__ == "__main__":
    # Module hyper-parameters (kept small).
    kernel_size = 3
    char_size = 20
    embedding_dim = 32
    output_channels = 128
    # dropout p is irrelevant at inference (identity).

    batch = 2
    seq_len = 16

    key = jax.random.PRNGKey(0)
    k_emb, k_w, k_b, k_ids = jax.random.split(key, 4)

    emb_table = jax.random.normal(k_emb, (char_size, embedding_dim), jnp.float32)
    conv_w = 0.1 * jax.random.normal(
        k_w, (output_channels, embedding_dim, kernel_size), jnp.float32)
    conv_b = 0.1 * jax.random.normal(k_b, (output_channels,), jnp.float32)
    ids = jax.random.randint(k_ids, (batch, seq_len), 0, char_size, jnp.int32)

    out = convolution_forward(ids, emb_table, conv_w, conv_b)
    jax.block_until_ready(out)

    # Cheap sanity check against a pure-JAX reference of the same math.
    x_ref = emb_table[ids]                                   # (B, L, E)
    l_out = seq_len - kernel_size + 1
    ref = jnp.zeros((batch, l_out, output_channels), jnp.float32)
    for k in range(kernel_size):
        ref = ref + jnp.einsum("ble,ce->blc",
                               x_ref[:, k:k + l_out, :], conv_w[:, :, k])
    ref = ref + conv_b[None, None, :]
    ref = jnp.maximum(jnp.max(ref, axis=1), 0.0)             # (B, C)
    assert jnp.allclose(out, ref, atol=1e-4, rtol=1e-4)

    print("KERNEL_OK")
</pallas_src>

<mosaic_0001>
module attributes {stable_mosaic.version = 11 : i64} {
  func.func @_conv_max_relu_kernel(%arg0: memref<28x3xi32, #tpu.memory_space<vmem>>, %arg1: memref<20x32xf32, #tpu.memory_space<vmem>>, %arg2: memref<3x32x128xf32, #tpu.memory_space<vmem>>, %arg3: memref<1x128xf32, #tpu.memory_space<vmem>>, %arg4: memref<2x128xf32, #tpu.memory_space<vmem>>) attributes {dimension_semantics = [], scalar_prefetch = 0 : i64, scratch_operands = 0 : i64, tpu.core_type = #tpu.core_type<tc>} {
    %c0 = arith.constant 0 : index
    %c0_0 = arith.constant 0 : index
    %0 = vector.load %arg1[%c0, %c0_0] : memref<20x32xf32, #tpu.memory_space<vmem>>, vector<20x32xf32>
    %c0_1 = arith.constant 0 : index
    %c0_2 = arith.constant 0 : index
    %1 = vector.load %arg0[%c0_1, %c0_2] : memref<28x3xi32, #tpu.memory_space<vmem>>, vector<28x3xi32>
    %2 = tpu.iota {dimensions = array<i32: 1>} : vector<28x20xi32>
    %cst = arith.constant 0.000000e+00 : f32
    %3 = vector.broadcast %cst : f32 to vector<28x128xf32>
    %4 = vector.extract_strided_slice %1 {offsets = [0, 0], sizes = [28, 1], strides = [1, 1]} : vector<28x3xi32> to vector<28x1xi32>
    %5 = vector.broadcast %4 : vector<28x1xi32> to vector<28x20xi32>
    %6 = arith.cmpi eq, %2, %5 : vector<28x20xi32>
    %7 = arith.extui %6 : vector<28x20xi1> to vector<28x20xi32>
    %8 = arith.sitofp %7 : vector<28x20xi32> to vector<28x20xf32>
    %cst_3 = arith.constant dense<0.000000e+00> : vector<28x32xf32>
    %9 = tpu.matmul %8, %0, %cst_3 {dimension_numbers = #tpu.dot_dimension_numbers<[1], [0], [0], [1], [0, 0, 1, 1], [], []>} : vector<28x20xf32>, vector<20x32xf32>, vector<28x32xf32> -> vector<28x32xf32>
    %c0_4 = arith.constant 0 : index
    %c0_5 = arith.constant 0 : index
    %c0_6 = arith.constant 0 : index
    %10 = vector.load %arg2[%c0_4, %c0_5, %c0_6] : memref<3x32x128xf32, #tpu.memory_space<vmem>>, vector<1x32x128xf32>
    %11 = vector.shape_cast %10 : vector<1x32x128xf32> to vector<32x128xf32>
    %cst_7 = arith.constant dense<0.000000e+00> : vector<28x128xf32>
    %12 = tpu.matmul %9, %11, %cst_7 {dimension_numbers = #tpu.dot_dimension_numbers<[1], [0], [0], [1], [0, 0, 1, 1], [], []>} : vector<28x32xf32>, vector<32x128xf32>, vector<28x128xf32> -> vector<28x128xf32>
    %13 = arith.addf %3, %12 : vector<28x128xf32>
    %14 = vector.extract_strided_slice %1 {offsets = [0, 1], sizes = [28, 1], strides = [1, 1]} : vector<28x3xi32> to vector<28x1xi32>
    %15 = vector.broadcast %14 : vector<28x1xi32> to vector<28x20xi32>
    %16 = arith.cmpi eq, %2, %15 : vector<28x20xi32>
    %17 = arith.extui %16 : vector<28x20xi1> to vector<28x20xi32>
    %18 = arith.sitofp %17 : vector<28x20xi32> to vector<28x20xf32>
    %cst_8 = arith.constant dense<0.000000e+00> : vector<28x32xf32>
    %19 = tpu.matmul %18, %0, %cst_8 {dimension_numbers = #tpu.dot_dimension_numbers<[1], [0], [0], [1], [0, 0, 1, 1], [], []>} : vector<28x20xf32>, vector<20x32xf32>, vector<28x32xf32> -> vector<28x32xf32>
    %c1 = arith.constant 1 : index
    %c0_9 = arith.constant 0 : index
    %c0_10 = arith.constant 0 : index
    %20 = vector.load %arg2[%c1, %c0_9, %c0_10] : memref<3x32x128xf32, #tpu.memory_space<vmem>>, vector<1x32x128xf32>
    %21 = vector.shape_cast %20 : vector<1x32x128xf32> to vector<32x128xf32>
    %cst_11 = arith.constant dense<0.000000e+00> : vector<28x128xf32>
    %22 = tpu.matmul %19, %21, %cst_11 {dimension_numbers = #tpu.dot_dimension_numbers<[1], [0], [0], [1], [0, 0, 1, 1], [], []>} : vector<28x32xf32>, vector<32x128xf32>, vector<28x128xf32> -> vector<28x128xf32>
    %23 = arith.addf %13, %22 : vector<28x128xf32>
    %24 = vector.extract_strided_slice %1 {offsets = [0, 2], sizes = [28, 1], strides = [1, 1]} : vector<28x3xi32> to vector<28x1xi32>
    %25 = vector.broadcast %24 : vector<28x1xi32> to vector<28x20xi32>
    %26 = arith.cmpi eq, %2, %25 : vector<28x20xi32>
    %27 = arith.extui %26 : vector<28x20xi1> to vector<28x20xi32>
    %28 = arith.sitofp %27 : vector<28x20xi32> to vector<28x20xf32>
    %cst_12 = arith.constant dense<0.000000e+00> : vector<28x32xf32>
    %29 = tpu.matmul %28, %0, %cst_12 {dimension_numbers = #tpu.dot_dimension_numbers<[1], [0], [0], [1], [0, 0, 1, 1], [], []>} : vector<28x20xf32>, vector<20x32xf32>, vector<28x32xf32> -> vector<28x32xf32>
    %c2 = arith.constant 2 : index
    %c0_13 = arith.constant 0 : index
    %c0_14 = arith.constant 0 : index
    %30 = vector.load %arg2[%c2, %c0_13, %c0_14] : memref<3x32x128xf32, #tpu.memory_space<vmem>>, vector<1x32x128xf32>
    %31 = vector.shape_cast %30 : vector<1x32x128xf32> to vector<32x128xf32>
    %cst_15 = arith.constant dense<0.000000e+00> : vector<28x128xf32>
    %32 = tpu.matmul %29, %31, %cst_15 {dimension_numbers = #tpu.dot_dimension_numbers<[1], [0], [0], [1], [0, 0, 1, 1], [], []>} : vector<28x32xf32>, vector<32x128xf32>, vector<28x128xf32> -> vector<28x128xf32>
    %33 = arith.addf %23, %32 : vector<28x128xf32>
    %34 = vector.extract_strided_slice %33 {offsets = [0, 0], sizes = [14, 128], strides = [1, 1]} : vector<28x128xf32> to vector<14x128xf32>
    %cst_16 = arith.constant dense<0xFF800000> : vector<128xf32>
    %35 = vector.multi_reduction <maximumf>, %34, %cst_16 [0] : vector<14x128xf32> to vector<128xf32>
    %36 = vector.shape_cast %35 : vector<128xf32> to vector<1x128xf32>
    %37 = vector.extract_strided_slice %33 {offsets = [14, 0], sizes = [14, 128], strides = [1, 1]} : vector<28x128xf32> to vector<14x128xf32>
    %cst_17 = arith.constant dense<0xFF800000> : vector<128xf32>
    %38 = vector.multi_reduction <maximumf>, %37, %cst_17 [0] : vector<14x128xf32> to vector<128xf32>
    %39 = vector.shape_cast %38 : vector<128xf32> to vector<1x128xf32>
    %40 = tpu.concatenate %36, %39 in 0 : vector<1x128xf32>, vector<1x128xf32> -> vector<2x128xf32>
    %c0_18 = arith.constant 0 : index
    %c0_19 = arith.constant 0 : index
    %41 = vector.load %arg3[%c0_18, %c0_19] : memref<1x128xf32, #tpu.memory_space<vmem>>, vector<1x128xf32>
    %42 = vector.broadcast %41 : vector<1x128xf32> to vector<2x128xf32>
    %43 = arith.addf %40, %42 : vector<2x128xf32>
    %cst_20 = arith.constant 0.000000e+00 : f32
    %44 = vector.broadcast %cst_20 : f32 to vector<2x128xf32>
    %45 = arith.maximumf %43, %44 : vector<2x128xf32>
    %c0_21 = arith.constant 0 : index
    %c0_22 = arith.constant 0 : index
    %46 = vector.load %arg4[%c0_21, %c0_22] : memref<2x128xf32, #tpu.memory_space<vmem>>, vector<2x128xf32>
    tpu.vector_store %arg4[%c0_21, %c0_22], %45 {strides = array<i32>} : memref<2x128xf32, #tpu.memory_space<vmem>>, vector<2x128xf32>,
    return
  }
}

</mosaic_0001>

<bundles_post_ra>
// kernel: tpu_custom_call.1
= control target key start
LH: loop header
LB: loop body
LE: loop exit
PB: predicated region body
PF: predicated region fallthrough
CT: control target
= control target key end

     0   :  { %9 = vsyncpa [#allocation3], 0  ;;  %s1131_s0 = inlined_call_operand.vmem [shape: s32[28,3], index: 0, kind: input, shape index: {}]   ;;  %s1132_s1 = inlined_call_operand.vmem [shape: f32[20,32], index: 1, kind: input, shape index: {}]   ;;  %s1133_s2 = inlined_call_operand.hbm [shape: f32[3,32,128], index: 2, kind: input, shape index: {}]   ;;  %s1134_s3 = inlined_call_operand.vmem [shape: f32[1,128], index: 3, kind: input, shape index: {}]   ;;  %s1135_s4 = inlined_call_operand.hbm [shape: f32[2,128], index: 4, kind: output, shape index: {}]  }
   0x1   :  { %10 = vsyncpa [#allocation4], 0  ;;  %s987_s15 = smov [#allocation2]  }
   0x2   :  { %s20_s16 = sshll.u32 %s987_s15, 4  ;;  %s21_s16 = int_to_ptr.vmem [resolvable:$true] %s20_s16 }
   0x3   :  { %s951_s17 = scalar_lea.vmem %s21_s16, 1536  ;;  %p956_p1 = scmp.lt.s32.totalorder %s21_s16, %s21_s16 }
   0x4   :  { %p952_p0 = scmp.ne.s32.totalorder %s21_s16, %s951_s17  ;;  %p957_p2 = scmp.lt.s32.totalorder %s951_s17, %s951_s17 }
   0x6   :  { %p958_p3 = por %p957_p2, %p956_p1 }
   0x8   :  { %p959_p4 = pnand %p958_p3, %p952_p0 }
   0xa   :  { %962 = shalt.err (!%p959_p4)
}
   0xb   :  { %s988_s18 = smov 128   ;;  %s989_s19 = smov 8  }
   0xc   :  { %26 = dma.hbm_to_vmem [thread:$0]  %s1133_s2, 1536, %s21_s16, [#allocation3], %s988_s18, %s988_s18, %s989_s19  }
   0xd   :  { %983 = dma.done.wait [#allocation3], 1536  }
   0xe   :  { %984 = vsyncadd [#allocation3], 4294965760  ;;  %v990_v0 = vmov 1   ;;  %vm78_vm0 = vcmask 1043456   ;;  %v37_v1 = vld [vmem:[%s1131_s0 + $0x10] sm:$0xff]  ;;  %v35_v2 = vld [vmem:[%s1131_s0] sm:$0xff]  ;;  %v39_v11 = vlaneseq }
   0xf   :  { %938 = vset.pattern.permute.xlu1 %v990_v0  ;;  %937 = vset.pattern.permute.xlu0 %v990_v0  ;;  %v1032_v3 = vld [vmem:[%s1132_s1 + $0x10] sm:$0xf]  ;;  %v1037_v4 = vld [vmem:[%s1132_s1 + $0x8] sm:$0xff]  ;;  %v38_v5 = vld [vmem:[%s1131_s0 + $0x18] sm:$0xf]  ;;  %v991_v8 = vmov 0  }
  0x10   :  { %178 = vperm.xlu1 %938, %v37_v1   ;;  %172 = vperm.xlu0 %937, %v35_v2   ;;  %v36_v6 = vld [vmem:[%s1131_s0 + $0x8] sm:$0xff]  ;;  %v1057_v7 = vld [vmem:[%s1132_s1] sm:$0xff]  ;;  %v296_v9 = vld [vmem:[#allocation2 + $0x38] sm:$0xff]  ;;  %v992_v10 = vmov 2   ;;  %v1066_v12 = vand.u32 127, %v39_v11  ;;  %vm65_vm1 = vcmask 162816  }
  0x11   :  { %863 = vmatprep.subr.msk.mxu1 %vm78_vm0, %v1032_v3  ;;  %851 = vmatprep.subr.msk.mxu0 %vm78_vm0, %v1032_v3  ;;  %v993_v15 = vmov 0.0   ;;  %v295_v26 = vld [vmem:[#allocation2 + $0x30] sm:$0xff]  ;;  %v294_v29 = vld [vmem:[#allocation2 + $0x28] sm:$0xff]  ;;  %v293_v32 = vld [vmem:[#allocation2 + $0x20] sm:$0xff]  ;;  %vm297_vm10 = vcmask 261120   ;;  %vm719_vm15 = vcmask 1045504  }
  0x12   :  { %864 = vmatpush3.msk.msra.mxu1 %vm78_vm0, %v1032_v3  ;;  %852 = vmatpush3.msk.msra.mxu0 %vm78_vm0, %v1032_v3  ;;  %v170_v33 = vld [vmem:[#allocation2 + $0x18] sm:$0xff]  ;;  %v169_v34 = vld [vmem:[#allocation2 + $0x10] sm:$0xff]  ;;  %v168_v35 = vld [vmem:[#allocation2 + $0x8] sm:$0xff]  ;;  %s994_s9 = smov [#allocation5]  }
  0x13   :  { %865 = vmatprep.subr.mxu1 %v1037_v4  ;;  %853 = vmatprep.subr.mxu0 %v1037_v4  ;;  %v167_v36 = vld [vmem:[#allocation2] sm:$0xff]  ;;  %v617_v53 = vld [vmem:[#allocation2 + $0x58] sm:$0xff]  ;;  %v616_v54 = vld [vmem:[#allocation2 + $0x50] sm:$0xff]  ;;  %s757_s10 = sshll.u32 %s994_s9, 4  ;;  %s758_s10 = int_to_ptr.vmem [resolvable:$true] %s757_s10 }
  0x14   :  { %181 = vperm.xlu1 %938, %v38_v5   ;;  %175 = vperm.xlu0 %937, %v36_v6   ;;  %v615_v55 = vld [vmem:[#allocation2 + $0x48] sm:$0xff]  ;;  %v614_v56 = vld [vmem:[#allocation2 + $0x40] sm:$0xff]  ;;  %s963_s11 = scalar_lea.vmem %s758_s10, 32  ;;  %p968_p6 = scmp.lt.s32.totalorder %s758_s10, %s758_s10 }
  0x15   :  { %866 = vmatpush3.msra.mxu1 %v1037_v4  ;;  %854 = vmatpush3.msra.mxu0 %v1037_v4  ;;  %p964_p5 = scmp.ne.s32.totalorder %s758_s10, %s963_s11  ;;  %p969_p7 = scmp.lt.s32.totalorder %s963_s11, %s963_s11 }
  0x16   :  { %867 = vmatprep.subr.mxu1 %v1057_v7  ;;  %855 = vmatprep.subr.mxu0 %v1057_v7 }
  0x17   :  { %868 = vmatpush3.msra.mxu1 %v1057_v7  ;;  %856 = vmatpush3.msra.mxu0 %v1057_v7  ;;  %p970_p8 = por %p969_p7, %p968_p6 }
  0x18   :  { %940 = vset.pattern.permute.xlu1 %v991_v8  ;;  %939 = vset.pattern.permute.xlu0 %v991_v8 }
  0x19   :  { %45 = vperm.xlu1 %940, %v36_v6   ;;  %42 = vperm.xlu0 %939, %v35_v2   ;;  %p971_p9 = pnand %p970_p8, %p964_p5 }
  0x1a   :  { %875 = vmatprep.subr.mxu0 %v296_v9  ;;  %889 = vmatprep.subr.mxu1 %v170_v33 }
  0x1d   :  { %48 = vperm.xlu1 %940, %v37_v1   ;;  %51 = vperm.xlu0 %939, %v38_v5  }
  0x21   :  { %941 = vset.pattern.permute.xlu1 %v992_v10  ;;  %942 = vset.pattern.permute.xlu0 %v992_v10 }
  0x22   :  { %493 = vperm.xlu1 %941, %v35_v2   ;;  %496 = vperm.xlu0 %942, %v36_v6  }
  0x26   :  { %499 = vperm.xlu1 %941, %v37_v1  }
  0x2a   :  { %502 = vperm.xlu1 %941, %v38_v5  }
  0x8b   :  { %v179_v13 = vpop.permute.xlu1 %178  ;;  %v173_v14 = vpop.permute.xlu0 %172 }
  0x8c   :  { %vm183_vm2 = vcmp.eq.s32.totalorder %v1066_v12, %v173_v14  ;;  %vm185_vm3 = vcmp.eq.s32.totalorder %v1066_v12, %v179_v13 }
  0x8d   :  { %v775_v16 = vsel %vm183_vm2, 1.0, %v993_v15  ;;  %v777_v19 = vsel %vm185_vm3, 1.0, %v993_v15  ;;  %vm739_vm2 = vcmask 1040384  }
  0x8e   :  { %869 = vmatprep.mubr.msk.f32.mxu1 %vm65_vm1, %v775_v16 }
  0x8f   :  { %v182_v17 = vpop.permute.xlu1 %181  ;;  %v176_v18 = vpop.permute.xlu0 %175 }
  0x90   :  { %vm184_vm4 = vcmp.eq.s32.totalorder %v1066_v12, %v176_v18  ;;  %vm186_vm5 = vcmp.eq.s32.totalorder %v1066_v12, %v182_v17 }
  0x91   :  { %v776_v20 = vsel %vm184_vm4, 1.0, %v993_v15  ;;  %v778_v23 = vsel %vm186_vm5, 1.0, %v993_v15 }
  0x92   :  { %870 = vmatmul.mubr.msk.f32.vlgmr.msra.gmra.mxu1 %vm65_vm1, %v776_v20 }
  0x93   :  { %872 = vmatprep.mubr.msk.f32.mxu1 %vm65_vm1, %v777_v19  ;;  %890 = vmatpush3.msra.mxu1 %v170_v33 }
  0x94   :  { %v46_v21 = vpop.permute.xlu1 %45  ;;  %v43_v22 = vpop.permute.xlu0 %42  ;;  %891 = vmatprep.subr.mxu1 %v169_v34 }
  0x95   :  { %vm54_vm6 = vcmp.eq.s32.totalorder %v1066_v12, %v46_v21  ;;  %vm53_vm7 = vcmp.eq.s32.totalorder %v1066_v12, %v43_v22  ;;  %892 = vmatpush3.msra.mxu1 %v169_v34 }
  0x96   :  { %v767_v24 = vsel %vm54_vm6, 1.0, %v993_v15  ;;  %873 = vmatmul.mubr.msk.f32.gmra.mxu1 %vm65_vm1, %v778_v23  ;;  %v766_v25 = vsel %vm53_vm7, 1.0, %v993_v15  ;;  %893 = vmatprep.subr.mxu1 %v168_v35 }
  0x97   :  { %857 = vmatprep.mubr.msk.f32.mxu0 %vm65_vm1, %v766_v25  ;;  %894 = vmatpush3.msra.mxu1 %v168_v35  ;;  %v805_v35 = vld [vmem:[%s1134_s3] ss:$0 sm:$0xff] }
  0x98   :  { %v49_v27 = vpop.permute.xlu1 %48  ;;  %858 = vmatmul.mubr.msk.f32.vlgmr.msra.gmra.mxu0 %vm65_vm1, %v767_v24  ;;  %v52_v28 = vpop.permute.xlu0 %51  ;;  %895 = vmatprep.subr.mxu1 %v167_v36 }
  0x99   :  { %vm55_vm8 = vcmp.eq.s32.totalorder %v1066_v12, %v49_v27  ;;  %vm56_vm9 = vcmp.eq.s32.totalorder %v1066_v12, %v52_v28  ;;  %876 = vmatpush3.msra.mxu0 %v296_v9  ;;  %896 = vmatpush3.msra.mxu1 %v167_v36 }
  0x9a   :  { %v768_v30 = vsel %vm55_vm8, 1.0, %v993_v15  ;;  %v769_v31 = vsel %vm56_vm9, 1.0, %v993_v15  ;;  %877 = vmatprep.subr.mxu0 %v295_v26  ;;  %915 = vmatprep.subr.mxu1 %v617_v53 }
  0x9b   :  { %860 = vmatprep.mubr.msk.f32.mxu0 %vm65_vm1, %v768_v30  ;;  %878 = vmatpush3.msra.mxu0 %v295_v26 }
  0x9c   :  { %861 = vmatmul.mubr.msk.f32.gmra.mxu0 %vm65_vm1, %v769_v31  ;;  %879 = vmatprep.subr.mxu0 %v294_v29 }
  0x9d   :  { %880 = vmatpush3.msra.mxu0 %v294_v29  ;;  %v494_v37 = vpop.permute.xlu1 %493  ;;  %v497_v41 = vpop.permute.xlu0 %496 }
  0x9e   :  { %881 = vmatprep.subr.mxu0 %v293_v32  ;;  %vm504_vm11 = vcmp.eq.s32.totalorder %v1066_v12, %v494_v37  ;;  %vm505_vm12 = vcmp.eq.s32.totalorder %v1066_v12, %v497_v41 }
  0x9f   :  { %882 = vmatpush3.msra.mxu0 %v293_v32  ;;  %v792_v43 = vsel %vm504_vm11, 1.0, %v993_v15  ;;  %v793_v48 = vsel %vm505_vm12, 1.0, %v993_v15 }
  0xa0   :  { %903 = vmatprep.subr.msk.mxu0 %vm78_vm0, %v1032_v3 }
  0xa1   :  { %v500_v40 = vpop.permute.xlu1 %499 }
  0xa2   :  { %vm506_vm13 = vcmp.eq.s32.totalorder %v1066_v12, %v500_v40 }
  0xa3   :  { %v794_v50 = vsel %vm506_vm13, 1.0, %v993_v15 }
  0xa5   :  { %v503_v47 = vpop.permute.xlu1 %502 }
  0xa6   :  { %vm507_vm14 = vcmp.eq.s32.totalorder %v1066_v12, %v503_v47 }
  0xa7   :  { %v795_v52 = vsel %vm507_vm14, 1.0, %v993_v15 }
 0x152   :  { %v871_v38 = vpop.f32.mrf.mxu1 }
 0x154   :  { %v273_v39 = vpop.f32.mrf.mxu1 }
 0x155   :  { %883 = vmatprep.mubr.msk.f32.mxu0 %vm297_vm10, %v273_v39 }
 0x156   :  { %v874_v42 = vpop.f32.mrf.mxu1  ;;  %884 = vmatmul.mubr.msk.f32.vlgmr.msra.gmra.mxu0 %vm297_vm10, %v871_v38 }
 0x157   :  { %904 = vmatpush3.msk.msra.mxu0 %vm78_vm0, %v1032_v3 }
 0x158   :  { %v859_v44 = vpop.f32.mrf.mxu0  ;;  %v283_v45 = vpop.f32.mrf.mxu1  ;;  %905 = vmatprep.subr.mxu0 %v1037_v4 }
 0x159   :  { %886 = vmatprep.mubr.msk.f32.mxu0 %vm297_vm10, %v283_v45  ;;  %906 = vmatpush3.msra.mxu0 %v1037_v4 }
 0x15a   :  { %v148_v46 = vpop.f32.mrf.mxu0  ;;  %887 = vmatmul.mubr.msk.f32.gmra.mxu0 %vm297_vm10, %v874_v42  ;;  %907 = vmatprep.subr.mxu0 %v1057_v7 }
 0x15b   :  { %897 = vmatprep.mubr.msk.f32.mxu1 %vm297_vm10, %v148_v46  ;;  %909 = vmatprep.mubr.msk.f32.mxu0 %vm65_vm1, %v792_v43 }
 0x15c   :  { %v862_v49 = vpop.f32.mrf.mxu0  ;;  %898 = vmatmul.mubr.msk.f32.vlgmr.msra.gmra.mxu1 %vm297_vm10, %v859_v44  ;;  %908 = vmatpush3.msra.mxu0 %v1057_v7 }
 0x15d   :  { %916 = vmatpush3.msra.mxu1 %v617_v53 }
 0x15e   :  { %v158_v51 = vpop.f32.mrf.mxu0  ;;  %910 = vmatmul.mubr.msk.f32.vlgmr.msra.gmra.mxu0 %vm65_vm1, %v793_v48  ;;  %917 = vmatprep.subr.mxu1 %v616_v54 }
 0x15f   :  { %900 = vmatprep.mubr.msk.f32.mxu1 %vm297_vm10, %v158_v51  ;;  %912 = vmatprep.mubr.msk.f32.mxu0 %vm65_vm1, %v794_v50 }
 0x160   :  { %901 = vmatmul.mubr.msk.f32.gmra.mxu1 %vm297_vm10, %v862_v49 }
 0x161   :  { %918 = vmatpush3.msra.mxu1 %v616_v54 }
 0x162   :  { %913 = vmatmul.mubr.msk.f32.gmra.mxu0 %vm65_vm1, %v795_v52  ;;  %919 = vmatprep.subr.mxu1 %v615_v55  ;;  %vm728_vm1 = vcmask 1047558  }
 0x163   :  { %920 = vmatpush3.msra.mxu1 %v615_v55 }
 0x164   :  { %921 = vmatprep.subr.mxu1 %v614_v56 }
 0x165   :  { %922 = vmatpush3.msra.mxu1 %v614_v56 }
 0x216   :  { %v885_v57 = vpop.f32.mrf.mxu0 }
 0x218   :  { %v376_v58 = vpop.f32.mrf.mxu0 }
 0x21a   :  { %v888_v59 = vpop.f32.mrf.mxu0 }
 0x21c   :  { %v386_v60 = vpop.f32.mrf.mxu0  ;;  %v899_v1 = vpop.f32.mrf.mxu1 }
 0x21d   :  { %v479_v5 = vadd.f32 %v899_v1, %v885_v57 }
 0x21e   :  { %v911_v61 = vpop.f32.mrf.mxu0  ;;  %v473_v2 = vpop.f32.mrf.mxu1 }
 0x21f   :  { %v474_v7 = vadd.f32 %v473_v2, %v376_v58 }
 0x220   :  { %v594_v62 = vpop.f32.mrf.mxu0  ;;  %v902_v3 = vpop.f32.mrf.mxu1 }
 0x221   :  { %923 = vmatprep.mubr.msk.f32.mxu1 %vm297_vm10, %v594_v62  ;;  %v489_v12 = vadd.f32 %v902_v3, %v888_v59 }
 0x222   :  { %v914_v63 = vpop.f32.mrf.mxu0  ;;  %924 = vmatmul.mubr.msk.f32.vlgmr.msra.gmra.mxu1 %vm297_vm10, %v911_v61  ;;  %v483_v4 = vpop.f32.mrf.mxu1 }
 0x223   :  { %v484_v14 = vadd.f32 %v483_v4, %v386_v60 }
 0x224   :  { %v604_v0 = vpop.f32.mrf.mxu0 }
 0x225   :  { %926 = vmatprep.mubr.msk.f32.mxu1 %vm297_vm10, %v604_v0 }
 0x226   :  { %927 = vmatmul.mubr.msk.f32.gmra.mxu1 %vm297_vm10, %v914_v63 }
 0x2e2   :  { %v925_v6 = vpop.f32.mrf.mxu1 }
 0x2e3   :  { %v716_v8 = vadd.f32 %v925_v6, %v479_v5 }
 0x2e4   :  { %v696_v9 = vpop.f32.mrf.mxu1 }
 0x2e5   :  { %v720_v10 = vsel %vm719_vm15, %v716_v8, -inf  ;;  %v715_v11 = vadd.f32 %v696_v9, %v474_v7  ;;  %v729_v20 = vsel %vm728_vm1, %v716_v8, -inf }
 0x2e6   :  { %v928_v13 = vpop.f32.mrf.mxu1 }
 0x2e7   :  { %v721_v15 = vmax.f32 %v715_v11, %v720_v10  ;;  %v718_v16 = vadd.f32 %v928_v13, %v489_v12 }
 0x2e8   :  { %v706_v17 = vpop.f32.mrf.mxu1 }
 0x2e9   :  { %v722_v18 = vrot.slane %v721_v15, 4  ;;  %v717_v19 = vadd.f32 %v706_v17, %v484_v14  ;;  %v730_v23 = vsel %vm78_vm0, %v718_v16, -inf }
 0x2eb   :  { %v723_v21 = vmax.f32 %v721_v15, %v722_v18  ;;  %v731_v22 = vmax.f32 %v729_v20, %v717_v19 }
 0x2ed   :  { %v724_v24 = vrot.slane %v723_v21, 2  ;;  %v732_v25 = vmax.f32 %v731_v22, %v730_v23 }
 0x2ef   :  { %v733_v26 = vrot.slane %v732_v25, 4  ;;  %v725_v27 = vmax.f32 %v723_v21, %v724_v24 }
 0x2f1   :  { %v734_v28 = vmax.f32 %v732_v25, %v733_v26  ;;  %v726_v30 = vrot.slane %v725_v27, 1 }
 0x2f3   :  { %v735_v29 = vrot.slane %v734_v28, 2  ;;  %v727_v33 = vmax.f32 %v725_v27, %v726_v30 }
 0x2f5   :  { %v736_v31 = vmax.f32 %v734_v28, %v735_v29 }
 0x2f7   :  { %v737_v32 = vrot.slane %v736_v31, 1 }
 0x2f9   :  { %v738_v34 = vmax.f32 %v736_v31, %v737_v32 }
 0x2fb   :  { %v740_v36 = vsel %vm739_vm2, %v727_v33, %v738_v34 }
 0x2fc   :  { %v748_v37 = vadd.f32 %v805_v35, %v740_v36 }
 0x2fe   :  { %v749_v38 = vmax.f32 %v748_v37, 0.0 }
 0x300   :  { %750 = vst [vmem:[#allocation5] sm:$0x3] %v749_v38 }
 0x301   :  { %974 = shalt.err (!%p971_p9)
}
 0x302   :  { %760 = dma.vmem_to_hbm [thread:$0]  %s758_s10, 32, %s1135_s4, [#allocation4]  }
 0x303   :  { %985 = dma.done.wait [#allocation4], 32  }
 0x304   :  { %986 = vsyncadd [#allocation4], 4294967264 }
 0x305   :  { %764 = vsyncpa [#allocation3], 1 }
 0x306   :  { %765 = vsyncpa [#allocation4], 1 }

</bundles_post_ra>
